<compile_context>
chip_gen: v6e
topology: v6e:2x2x1
jax: 0.10.0
libtpu: 0.0.40
codegen_flags: <defaults>
</compile_context>

<pallas_src>
import functools

import jax
import jax.numpy as jnp
from jax.experimental import pallas as pl
from jax.experimental.pallas import tpu as pltpu

_EPS = 1e-5
_LANE = 128
_TARGET_VMEM_BYTES = 8 * 1024 * 1024    # total per-step working-set budget
_VMEM_LIMIT_BYTES = 32 * 1024 * 1024    # safe on v5e/v6e/v7x
_MIN_GRID_STEPS = 8                     # >= 2 per TC + pipeline depth


def _round_up(x, m):
    return ((x + m - 1) // m) * m


def _withbias_ln_kernel(x_ref, w_ref, b_ref, o_ref):
    # x_ref block: (1, C, T) -- C on sublanes, spatial tile T on lanes.
    x = x_ref[0].astype(jnp.float32)                            # (C, T)
    mu = jnp.mean(x, axis=0, keepdims=True)                     # (1, T)
    # One-pass biased variance: E[x^2] - mu^2 (no centered temp for stats).
    var = jnp.mean(x * x, axis=0, keepdims=True) - mu * mu
    inv = jax.lax.rsqrt(jnp.maximum(var, 0.0) + _EPS)           # (1, T)
    w = w_ref[...].astype(jnp.float32)                          # (C, 1)
    b = b_ref[...].astype(jnp.float32)                          # (C, 1)
    y = (x - mu) * (inv * w) + b
    o_ref[0] = y.astype(o_ref.dtype)


def _biasfree_ln_kernel(x_ref, w_ref, o_ref):
    x = x_ref[0].astype(jnp.float32)                            # (C, T)
    mu = jnp.mean(x, axis=0, keepdims=True)
    var = jnp.mean(x * x, axis=0, keepdims=True) - mu * mu      # biased var
    inv = jax.lax.rsqrt(jnp.maximum(var, 0.0) + _EPS)
    w = w_ref[...].astype(jnp.float32)                          # (C, 1)
    # BiasFree variant normalizes x itself (no mean subtraction in the output).
    y = x * (inv * w)
    o_ref[0] = y.astype(o_ref.dtype)


def _pick_hw_tile(hw, c, itemsize, batch):
    """Lane-dense spatial tile sized from the real VMEM working set and capped
    so the grid keeps enough steps for pipelining / dual-TC scaling."""
    # Sublane padding of the channel axis (8 for 32-bit, 16 for bf16, ...).
    sub = 8 if itemsize >= 4 else (32 // itemsize)
    c_pad = _round_up(c, sub)
    # Per-column bytes: input + output, each double-buffered, plus ~3 f32 temps.
    bytes_per_col = c_pad * (4 * itemsize + 3 * 4)
    budget_cols = max(_LANE, _TARGET_VMEM_BYTES // bytes_per_col)
    budget_cols = (budget_cols // _LANE) * _LANE

    # Keep >= ~_MIN_GRID_STEPS total grid steps when batch is small, but never
    # shrink the lane extent below 512 columns for that reason alone.
    steps_per_batch = pl.cdiv(_MIN_GRID_STEPS, max(1, batch))
    step_cap = _round_up(pl.cdiv(hw, steps_per_batch), _LANE)
    step_cap = max(step_cap, 4 * _LANE)

    tile = min(budget_cols, step_cap)
    hw_up = _round_up(hw, _LANE)
    return max(_LANE, min(hw_up, tile))


@functools.partial(jax.jit, static_argnames=("layernorm_type",))
def layernorm_nchw(x, weight, bias, layernorm_type="WithBias"):
    """Pallas equivalent of LayerNorm(dim, LayerNorm_type).forward(x).

    x: (B, C, H, W) NCHW (same as PyTorch);  weight, bias: (C,)
    """
    b, c, h, w = x.shape
    hw = h * w
    x3 = x.reshape(b, c, hw)                 # free contiguous reshape, no transpose

    itemsize = jnp.dtype(x.dtype).itemsize
    tile = _pick_hw_tile(hw, c, itemsize, b)
    grid = (b, pl.cdiv(hw, tile))            # ragged last block handled by Mosaic

    x_spec = pl.BlockSpec((1, c, tile), lambda bi, ti: (bi, 0, ti))
    p_spec = pl.BlockSpec((c, 1), lambda bi, ti: (0, 0))

    w2d = weight.reshape(c, 1)

    compiler_params = pltpu.CompilerParams(
        dimension_semantics=("parallel", "parallel"),
        vmem_limit_bytes=_VMEM_LIMIT_BYTES,
    )
    out_shape = jax.ShapeDtypeStruct((b, c, hw), x.dtype)

    if layernorm_type == "BiasFree":
        out3 = pl.pallas_call(
            _biasfree_ln_kernel,
            out_shape=out_shape,
            grid_spec=pltpu.PrefetchScalarGridSpec(
                num_scalar_prefetch=0,
                grid=grid,
                in_specs=[x_spec, p_spec],
                out_specs=x_spec,
            ),
            compiler_params=compiler_params,
        )(x3, w2d)
    else:
        b2d = bias.reshape(c, 1)
        out3 = pl.pallas_call(
            _withbias_ln_kernel,
            out_shape=out_shape,
            grid_spec=pltpu.PrefetchScalarGridSpec(
                num_scalar_prefetch=0,
                grid=grid,
                in_specs=[x_spec, p_spec, p_spec],
                out_specs=x_spec,
            ),
            compiler_params=compiler_params,
        )(x3, w2d, b2d)

    return out3.reshape(b, c, h, w)


def _reference_nchw(x, weight, bias, layernorm_type):
    b, c, h, w = x.shape
    x3 = jnp.transpose(x, (0, 2, 3, 1)).reshape(b, h * w, c).astype(jnp.float32)
    mu = jnp.mean(x3, axis=-1, keepdims=True)
    var = jnp.mean((x3 - mu) ** 2, axis=-1, keepdims=True)
    if layernorm_type == "BiasFree":
        y = x3 / jnp.sqrt(var + _EPS) * weight.astype(jnp.float32)
    else:
        y = (x3 - mu) / jnp.sqrt(var + _EPS) * weight.astype(jnp.float32) \
            + bias.astype(jnp.float32)
    return jnp.transpose(y.reshape(b, h, w, c), (0, 3, 1, 2)).astype(x.dtype)


if __name__ == "__main__":
    key = jax.random.PRNGKey(0)
    ok = True

    # Case 1: module-style shapes and init (weight=ones, bias=zeros).
    B, C, H, W = 2, 4, 16, 16
    k0, k1, k2 = jax.random.split(key, 3)
    x = jax.random.normal(k0, (B, C, H, W), dtype=jnp.float32)
    weight = jnp.ones((C,), dtype=jnp.float32)
    bias = jnp.zeros((C,), dtype=jnp.float32)
    for ln_type in ("WithBias", "BiasFree"):
        out = jax.block_until_ready(layernorm_nchw(x, weight, bias, layernorm_type=ln_type))
        ref = _reference_nchw(x, weight, bias, ln_type)
        ok &= out.shape == (B, C, H, W)
        ok &= bool(jnp.allclose(out, ref, atol=1e-5, rtol=1e-5))

    # Case 2: non-trivial affine params to exercise the (C,1) broadcast.
    weight2 = jax.random.normal(k1, (C,), dtype=jnp.float32)
    bias2 = jax.random.normal(k2, (C,), dtype=jnp.float32)
    for ln_type in ("WithBias", "BiasFree"):
        out = jax.block_until_ready(layernorm_nchw(x, weight2, bias2, layernorm_type=ln_type))
        ref = _reference_nchw(x, weight2, bias2, ln_type)
        ok &= bool(jnp.allclose(out, ref, atol=1e-5, rtol=1e-5))

    # Case 3: odd spatial size (H*W < 128) exercising the masked single ragged block.
    B2, C2, H2, W2 = 1, 3, 5, 7
    x_odd = jax.random.normal(k1, (B2, C2, H2, W2), dtype=jnp.float32)
    w_odd = jnp.ones((C2,), dtype=jnp.float32)
    b_odd = jnp.zeros((C2,), dtype=jnp.float32)
    for ln_type in ("WithBias", "BiasFree"):
        out = jax.block_until_ready(layernorm_nchw(x_odd, w_odd, b_odd, layernorm_type=ln_type))
        ref = _reference_nchw(x_odd, w_odd, b_odd, ln_type)
        ok &= out.shape == (B2, C2, H2, W2)
        ok &= bool(jnp.allclose(out, ref, atol=1e-5, rtol=1e-5))

    # Case 4: multi-tile grid with a ragged tail block (1600 = 3*512 + 64).
    B3, C3, H3, W3 = 1, 8, 40, 40
    x_big = jax.random.normal(k2, (B3, C3, H3, W3), dtype=jnp.float32)
    w_big = jax.random.normal(k0, (C3,), dtype=jnp.float32)
    b_big = jax.random.normal(k1, (C3,), dtype=jnp.float32)
    for ln_type in ("WithBias", "BiasFree"):
        out = jax.block_until_ready(layernorm_nchw(x_big, w_big, b_big, layernorm_type=ln_type))
        ref = _reference_nchw(x_big, w_big, b_big, ln_type)
        ok &= out.shape == (B3, C3, H3, W3)
        ok &= bool(jnp.allclose(out, ref, atol=1e-5, rtol=1e-5))

    if ok:
        print("KERNEL_OK")
</pallas_src>

<mosaic_0001>
module attributes {stable_mosaic.version = 11 : i64} {
  func.func @_withbias_ln_kernel(%arg0: i32, %arg1: i32, %arg2: memref<1x4x256xf32, #tpu.memory_space<vmem>>, %arg3: memref<4x1xf32, #tpu.memory_space<vmem>>, %arg4: memref<4x1xf32, #tpu.memory_space<vmem>>, %arg5: memref<1x4x256xf32, #tpu.memory_space<vmem>>) attributes {dimension_semantics = [#tpu.dimension_semantics<parallel>, #tpu.dimension_semantics<parallel>], iteration_bounds = array<i64: 2, 1>, scalar_prefetch = 0 : i64, scratch_operands = 0 : i64, tpu.core_type = #tpu.core_type<tc>, window_params = [{transform_indices = @transform_0, window_bounds = array<i64: 1, 4, 256>}, {pipeline_mode = #tpu.pipeline_mode<synchronous>, transform_indices = @transform_1, window_bounds = array<i64: 4, 1>}, {pipeline_mode = #tpu.pipeline_mode<synchronous>, transform_indices = @transform_2, window_bounds = array<i64: 4, 1>}, {transform_indices = @transform_3, window_bounds = array<i64: 1, 4, 256>}]} {
    %c0 = arith.constant 0 : index
    %c0_0 = arith.constant 0 : index
    %c0_1 = arith.constant 0 : index
    %0 = vector.load %arg2[%c0, %c0_0, %c0_1] : memref<1x4x256xf32, #tpu.memory_space<vmem>>, vector<1x4x256xf32>
    %1 = vector.shape_cast %0 : vector<1x4x256xf32> to vector<4x256xf32>
    %cst = arith.constant dense<0.000000e+00> : vector<256xf32>
    %2 = vector.multi_reduction <add>, %1, %cst [0] : vector<4x256xf32> to vector<256xf32>
    %3 = vector.shape_cast %2 : vector<256xf32> to vector<1x256xf32>
    %cst_2 = arith.constant 4.000000e+00 : f32
    %4 = vector.broadcast %cst_2 : f32 to vector<1x256xf32>
    %5 = arith.divf %3, %4 : vector<1x256xf32>
    %6 = arith.mulf %1, %1 : vector<4x256xf32>
    %cst_3 = arith.constant dense<0.000000e+00> : vector<256xf32>
    %7 = vector.multi_reduction <add>, %6, %cst_3 [0] : vector<4x256xf32> to vector<256xf32>
    %8 = vector.shape_cast %7 : vector<256xf32> to vector<1x256xf32>
    %cst_4 = arith.constant 4.000000e+00 : f32
    %9 = vector.broadcast %cst_4 : f32 to vector<1x256xf32>
    %10 = arith.divf %8, %9 : vector<1x256xf32>
    %11 = arith.mulf %5, %5 : vector<1x256xf32>
    %12 = arith.subf %10, %11 : vector<1x256xf32>
    %cst_5 = arith.constant 0.000000e+00 : f32
    %13 = vector.broadcast %cst_5 : f32 to vector<1x256xf32>
    %14 = arith.maximumf %12, %13 : vector<1x256xf32>
    %cst_6 = arith.constant 9.99999974E-6 : f32
    %15 = vector.broadcast %cst_6 : f32 to vector<1x256xf32>
    %16 = arith.addf %14, %15 : vector<1x256xf32>
    %17 = math.rsqrt %16 : vector<1x256xf32>
    %c0_7 = arith.constant 0 : index
    %c0_8 = arith.constant 0 : index
    %18 = vector.load %arg3[%c0_7, %c0_8] : memref<4x1xf32, #tpu.memory_space<vmem>>, vector<4x1xf32>
    %c0_9 = arith.constant 0 : index
    %c0_10 = arith.constant 0 : index
    %19 = vector.load %arg4[%c0_9, %c0_10] : memref<4x1xf32, #tpu.memory_space<vmem>>, vector<4x1xf32>
    %20 = vector.broadcast %5 : vector<1x256xf32> to vector<4x256xf32>
    %21 = arith.subf %1, %20 : vector<4x256xf32>
    %22 = vector.broadcast %17 : vector<1x256xf32> to vector<4x256xf32>
    %23 = vector.broadcast %18 : vector<4x1xf32> to vector<4x256xf32>
    %24 = arith.mulf %22, %23 : vector<4x256xf32>
    %25 = arith.mulf %21, %24 : vector<4x256xf32>
    %26 = vector.broadcast %19 : vector<4x1xf32> to vector<4x256xf32>
    %27 = arith.addf %25, %26 : vector<4x256xf32>
    %c0_11 = arith.constant 0 : index
    %c0_12 = arith.constant 0 : index
    %c0_13 = arith.constant 0 : index
    %28 = vector.load %arg5[%c0_11, %c0_12, %c0_13] : memref<1x4x256xf32, #tpu.memory_space<vmem>>, vector<1x4x256xf32>
    %29 = vector.shape_cast %28 : vector<1x4x256xf32> to vector<4x256xf32>
    %30 = vector.shape_cast %27 : vector<4x256xf32> to vector<1x4x256xf32>
    tpu.vector_store %arg5[%c0_11, %c0_12, %c0_13], %30 {strides = array<i32>} : memref<1x4x256xf32, #tpu.memory_space<vmem>>, vector<1x4x256xf32>,
    return
  }
  func.func @transform_0(%arg0: i32, %arg1: i32) -> (i32, i32, i32) {
    %c0_i32 = arith.constant 0 : i32
    %c0_i32_0 = arith.constant 0 : i32
    return %arg0, %c0_i32, %arg1 : i32, i32, i32
  }
  func.func @transform_1(%arg0: i32, %arg1: i32) -> (i32, i32) {
    %c0_i32 = arith.constant 0 : i32
    %c0_i32_0 = arith.constant 0 : i32
    %c0_i32_1 = arith.constant 0 : i32
    return %c0_i32, %c0_i32_0 : i32, i32
  }
  func.func @transform_2(%arg0: i32, %arg1: i32) -> (i32, i32) {
    %c0_i32 = arith.constant 0 : i32
    %c0_i32_0 = arith.constant 0 : i32
    %c0_i32_1 = arith.constant 0 : i32
    return %c0_i32, %c0_i32_0 : i32, i32
  }
  func.func @transform_3(%arg0: i32, %arg1: i32) -> (i32, i32, i32) {
    %c0_i32 = arith.constant 0 : i32
    %c0_i32_0 = arith.constant 0 : i32
    return %arg0, %c0_i32, %arg1 : i32, i32, i32
  }
}

</mosaic_0001>

<bundles_post_ra>
// kernel: layernorm_nchw.1
= control target key start
LH: loop header
LB: loop body
LE: loop exit
PB: predicated region body
PF: predicated region fallthrough
CT: control target
= control target key end

     0   :  { %s473_s12 = smov 0   ;;  %s475_s13 = smov 0   ;;  %s519_s0 = inlined_call_operand.vmem [shape: f32[2,4,256], index: 0, kind: input, shape index: {}]   ;;  %s520_s1 = inlined_call_operand.vmem [shape: f32[4,1], index: 1, kind: input, shape index: {}]   ;;  %s521_s2 = inlined_call_operand.vmem [shape: f32[4,1], index: 2, kind: input, shape index: {}]   ;;  %s522_s3 = inlined_call_operand.vmem [shape: f32[2,4,256], index: 3, kind: output, shape index: {}]  }
   0x1   :  { %s477_s14 = smov 0  }
   0x2 LB: > { %s25_s15 = sadd.s32 1, %s445_s13  ;;  %p386_p0 = scmp.ge.s32.totalorder %s449_s14, 1  ;;  %s449_s14 = sphi %s477_s14, %s13_s14   ;;  %s445_s13 = sphi %s475_s13, %s524_s13   ;;  %s441_s12 = sphi %s473_s12, %s523_s12  }
   0x3   : > { %p27_p1 = scmp.ge.s32.totalorder %s25_s15, 2  ;;  %p158_p2 = scmp.lt.s32.totalorder %s449_s14, 3 }
   0x5   : > { %s526_s15 = smov (%p27_p1, %s25_s15), 0  ;;  %p159_p3 = pnand %p386_p0, %p158_p2 }
   0x6   : > { %p191_p4 = scmp.lt.s32.totalorder (!%p159_p3), %s441_s12, 1 }
   0x7   : > { %162 = sbr.rel (%p159_p3) target bundleno = 147 (0x93), region = 32 }
   0xc   : > { %v262_v0 = vld [vmem:[%s520_s1] sm:$0xf]  ;;  %v451_v1 = vmov 0   ;;  %s528_s12 = smov (!%p191_p4, %s441_s12), 1  ;;  %vm214_vm0 = vcmask 1043456   ;;  %v288_v49 = vlaneseq }
   0xd   : > { %421 = vset.pattern.permute.xlu0 %v451_v1  ;;  %v263_v2 = vld [vmem:[%s521_s2] sm:$0xf]  ;;  %s393_s20 = sshll.u32 %s528_s12, 3  ;;  %v452_v47 = vmov 839922192  }
   0xe   : > { %271 = vperm.xlu0 %421, %v262_v0   ;;  %s198_s23 = scalar_lea.vmem %s519_s0, %s393_s20  ;;  %v286_v48 = vunpack.c.l.s4 %v452_v47  ;;  %v289_v52 = vshrl.u32 %v288_v49, 7  ;;  %s208_s26 = scalar_lea.vmem %s522_s3, %s393_s20 }
   0xf   : > { %v210_v3 = vld [vmem:[%s198_s23] sm:$0xff] }
  0x10   : > { %v212_v4 = vcombine.high %v210_v3, %v210_v3  ;;  %v232_v5 = vmul.f32 %v210_v3, %v210_v3  ;;  %v215_v6 = vsel %vm214_vm0, %v210_v3, 0.0  ;;  %v287_v51 = vunpack.c.0.s8 %v286_v48 }
  0x11   : > { %v216_v9 = vrot.slane %v215_v6, 4 }
  0x12   : > { %283 = vperm.xlu0 %421, %v263_v2   ;;  %v222_v7 = vsel %vm214_vm0, %v212_v4, 0.0  ;;  %v234_v8 = vcombine.high %v232_v5, %v232_v5  ;;  %v236_v11 = vsel %vm214_vm0, %v232_v5, 0.0  ;;  %v290_v58 = vsub.s32 %v287_v51, %v289_v52 }
  0x13   : > { %v223_v10 = vrot.slane %v222_v7, 4  ;;  %v217_v13 = vadd.f32 %v216_v9, %v215_v6  ;;  %v237_v14 = vrot.slane %v236_v11, 4 }
  0x14   : > { %v243_v12 = vsel %vm214_vm0, %v234_v8, 0.0 }
  0x15   : > { %v224_v15 = vadd.f32 %v223_v10, %v222_v7  ;;  %v244_v16 = vrot.slane %v243_v12, 4  ;;  %v218_v17 = vrot.slane %v217_v13, 2  ;;  %v238_v18 = vadd.f32 %v237_v14, %v236_v11 }
  0x17   : > { %v225_v19 = vrot.slane %v224_v15, 2  ;;  %v245_v20 = vadd.f32 %v244_v16, %v243_v12  ;;  %v219_v21 = vadd.f32 %v218_v17, %v217_v13  ;;  %v239_v22 = vrot.slane %v238_v18, 2 }
  0x19   : > { %v226_v23 = vadd.f32 %v225_v19, %v224_v15  ;;  %v246_v24 = vrot.slane %v245_v20, 2  ;;  %v220_v25 = vrot.slane %v219_v21, 1  ;;  %v240_v26 = vadd.f32 %v239_v22, %v238_v18 }
  0x1b   : > { %v227_v27 = vrot.slane %v226_v23, 1  ;;  %v247_v28 = vadd.f32 %v246_v24, %v245_v20  ;;  %v221_v29 = vadd.f32 %v220_v25, %v219_v21  ;;  %v241_v30 = vrot.slane %v240_v26, 1 }
  0x1d   : > { %v228_v31 = vadd.f32 %v227_v27, %v226_v23  ;;  %v248_v32 = vrot.slane %v247_v28, 1  ;;  %v230_v33 = vmul.f32 0.25, %v221_v29  ;;  %v242_v34 = vadd.f32 %v241_v30, %v240_v26 }
  0x1f   : > { %v231_v35 = vmul.f32 0.25, %v228_v31  ;;  %v249_v36 = vadd.f32 %v248_v32, %v247_v28  ;;  %v250_v37 = vmul.f32 0.25, %v242_v34  ;;  %v252_v38 = vmul.f32 %v230_v33, %v230_v33 }
  0x21   : > { %v251_v39 = vmul.f32 0.25, %v249_v36  ;;  %v253_v40 = vmul.f32 %v231_v35, %v231_v35  ;;  %v254_v41 = vsub.f32 %v250_v37, %v252_v38  ;;  %v266_v53 = vcombine.low %v230_v33, %v231_v35 }
  0x23   : > { %v255_v42 = vsub.f32 %v251_v39, %v253_v40  ;;  %v256_v43 = vmax.f32 %v254_v41, 0.0  ;;  %v268_v59 = vsub.f32 %v210_v3, %v266_v53 }
  0x25   : > { %v257_v44 = vmax.f32 %v255_v42, 0.0  ;;  %v258_v45 = vadd.f32 1e-05, %v256_v43 }
  0x27   : > { %v259_v46 = vadd.f32 1e-05, %v257_v44  ;;  %423 = vrsqrt.f32 %v258_v45 }
  0x29   : > { %425 = vrsqrt.f32 %v259_v46 }
  0x34   : > { %v424_v50 = vpop.eup %423 }
  0x36   : > { %v426_v54 = vpop.eup %425 }
  0x89   : > { %v272_v55 = vpop.permute.xlu0 %271 }
  0x8a   : > { %v274_v56 = vmul.f32 %v424_v50, %v272_v55  ;;  %v275_v57 = vmul.f32 %v426_v54, %v272_v55 }
  0x8c   : > { %v278_v60 = vcombine.low %v274_v56, %v275_v57 }
  0x8d   : > { %v284_v61 = vpop.permute.xlu0 %283 }
  0x8e   : > { %v280_v62 = vmul.f32 %v278_v60, %v268_v59  ;;  %v291_v63 = vrot.slane %v284_v61, %v290_v58 }
  0x90   : > { %v293_v0 = vadd.f32 %v291_v63, %v280_v62 }
  0x92   : > { %294 = vst [vmem:[%s208_s26] sm:$0xff] %v293_v0 }
  0x93 PF: > { %s13_s14 = sadd.s32 1, %s449_s14   ;;  %s523_s12 = smov %s445_s13 }
  0x94   : > { %p10_p5 = scmp.ge.s32.totalorder %s13_s14, 4   ;;  %s524_s13 = smov %s526_s15 }
  0x96   :  { %12 = sbr.rel (!%p10_p5) target bundleno = 2 (0x2), region = 62 }

</bundles_post_ra>
